<compile_context>
chip_gen: v5e
topology: v5e:2x2
jax: 0.10.0
libtpu: 0.0.40
codegen_flags: <defaults>
</compile_context>

<pallas_src>
import jax
import jax.numpy as jnp
from jax.experimental import pallas as pl
from jax.experimental.pallas import tpu as pltpu


def _identity_copy_kernel(o1_ref, o2_ref, out1_ref, out2_ref, sem):
    # Two overlapping HBM->HBM DMAs; no VMEM round trip, no compute.
    cp1 = pltpu.make_async_copy(o1_ref, out1_ref, sem.at[0])
    cp2 = pltpu.make_async_copy(o2_ref, out2_ref, sem.at[1])
    cp1.start()
    cp2.start()
    cp1.wait()
    cp2.wait()


def _pallas_identity_copy(outputs1, outputs2):
    bytes_accessed = 2 * (
        outputs1.size * outputs1.dtype.itemsize
        + outputs2.size * outputs2.dtype.itemsize
    )
    out_a, out_b = pl.pallas_call(
        _identity_copy_kernel,
        out_shape=(
            jax.ShapeDtypeStruct(outputs1.shape, outputs1.dtype),
            jax.ShapeDtypeStruct(outputs2.shape, outputs2.dtype),
        ),
        in_specs=[
            pl.BlockSpec(memory_space=pl.ANY),
            pl.BlockSpec(memory_space=pl.ANY),
        ],
        out_specs=(
            pl.BlockSpec(memory_space=pl.ANY),
            pl.BlockSpec(memory_space=pl.ANY),
        ),
        scratch_shapes=[pltpu.SemaphoreType.DMA((2,))],
        cost_estimate=pl.CostEstimate(
            flops=0, transcendentals=0, bytes_accessed=bytes_accessed
        ),
    )(outputs1, outputs2)
    return out_a, out_b


def double_output_transform(outputs1, outputs2, extra_params=None, *, materialize=False):
    """Pallas/JAX equivalent of DoubleOutputTransform.forward.

    The module is a pure identity, so by default (materialize=False) this
    moves zero bytes and returns the inputs unchanged -- the roofline-optimal
    implementation (JAX arrays are immutable, no copy is semantically needed).
    Set materialize=True to route through the Pallas HBM->HBM DMA copy kernel
    when a physically distinct output buffer is required.
    extra_params is accepted for signature parity and ignored, like the module.
    """
    del extra_params  # unused, per the reference module
    if not materialize:
        return outputs1, outputs2
    return _pallas_identity_copy(outputs1, outputs2)


if __name__ == "__main__":
    key = jax.random.PRNGKey(0)
    k1, k2, k3 = jax.random.split(key, 3)

    # Shapes consistent with a typical (conv-output, seq-output) pair.
    outputs1 = jax.random.normal(k1, (2, 4, 16, 16), dtype=jnp.float32)  # NCHW
    outputs2 = jax.random.normal(k2, (2, 8, 32), dtype=jnp.float32)
    extra_params = jax.random.normal(k3, (4,), dtype=jnp.float32)  # ignored

    # Default (optimal) zero-copy path.
    f1, f2 = double_output_transform(outputs1, outputs2, extra_params)
    jax.block_until_ready((f1, f2))

    # Pallas kernel path (HBM->HBM DMA identity copy), run once.
    out1, out2 = double_output_transform(outputs1, outputs2, extra_params, materialize=True)
    jax.block_until_ready((out1, out2))

    assert out1.shape == outputs1.shape and out1.dtype == outputs1.dtype
    assert out2.shape == outputs2.shape and out2.dtype == outputs2.dtype
    assert bool(jnp.all(out1 == outputs1)) and bool(jnp.all(out2 == outputs2))
    assert bool(jnp.all(f1 == outputs1)) and bool(jnp.all(f2 == outputs2))

    print("KERNEL_OK")
</pallas_src>

<mosaic_0001>
module attributes {stable_mosaic.version = 11 : i64} {
  func.func @_identity_copy_kernel(%arg0: memref<2x4x16x16xf32, #tpu.memory_space<any>>, %arg1: memref<2x8x32xf32, #tpu.memory_space<any>>, %arg2: memref<2x4x16x16xf32, #tpu.memory_space<any>>, %arg3: memref<2x8x32xf32, #tpu.memory_space<any>>, %arg4: memref<2x!tpu.dma_semaphore, #tpu.memory_space<semaphore_mem>>) attributes {dimension_semantics = [], scalar_prefetch = 0 : i64, scratch_operands = 1 : i64, tpu.core_type = #tpu.core_type<tc>} {
    %c0_i32 = arith.constant 0 : i32
    %0 = tpu.memref_slice %arg4[%c0_i32] : memref<2x!tpu.dma_semaphore, #tpu.memory_space<semaphore_mem>> -> memref<1x!tpu.dma_semaphore, #tpu.memory_space<semaphore_mem>>
    %1 = tpu.memref_squeeze %0 : memref<1x!tpu.dma_semaphore, #tpu.memory_space<semaphore_mem>> -> memref<!tpu.dma_semaphore, #tpu.memory_space<semaphore_mem>>
    tpu.enqueue_dma source(%arg0 : memref<2x4x16x16xf32, #tpu.memory_space<any>>) target(%arg2 : memref<2x4x16x16xf32, #tpu.memory_space<any>>) target_semaphore(%1 : memref<!tpu.dma_semaphore, #tpu.memory_space<semaphore_mem>>)
    %c1_i32 = arith.constant 1 : i32
    %2 = tpu.memref_slice %arg4[%c1_i32] : memref<2x!tpu.dma_semaphore, #tpu.memory_space<semaphore_mem>> -> memref<1x!tpu.dma_semaphore, #tpu.memory_space<semaphore_mem>>
    %3 = tpu.memref_squeeze %2 : memref<1x!tpu.dma_semaphore, #tpu.memory_space<semaphore_mem>> -> memref<!tpu.dma_semaphore, #tpu.memory_space<semaphore_mem>>
    tpu.enqueue_dma source(%arg1 : memref<2x8x32xf32, #tpu.memory_space<any>>) target(%arg3 : memref<2x8x32xf32, #tpu.memory_space<any>>) target_semaphore(%3 : memref<!tpu.dma_semaphore, #tpu.memory_space<semaphore_mem>>)
    %c0_i32_0 = arith.constant 0 : i32
    %4 = tpu.memref_slice %arg4[%c0_i32_0] : memref<2x!tpu.dma_semaphore, #tpu.memory_space<semaphore_mem>> -> memref<1x!tpu.dma_semaphore, #tpu.memory_space<semaphore_mem>>
    %5 = tpu.memref_squeeze %4 : memref<1x!tpu.dma_semaphore, #tpu.memory_space<semaphore_mem>> -> memref<!tpu.dma_semaphore, #tpu.memory_space<semaphore_mem>>
    tpu.wait_dma2 semaphore(%5 : memref<!tpu.dma_semaphore, #tpu.memory_space<semaphore_mem>>) src(%arg0 : memref<2x4x16x16xf32, #tpu.memory_space<any>>) dst(%arg2 : memref<2x4x16x16xf32, #tpu.memory_space<any>>)
    %c1_i32_1 = arith.constant 1 : i32
    %6 = tpu.memref_slice %arg4[%c1_i32_1] : memref<2x!tpu.dma_semaphore, #tpu.memory_space<semaphore_mem>> -> memref<1x!tpu.dma_semaphore, #tpu.memory_space<semaphore_mem>>
    %7 = tpu.memref_squeeze %6 : memref<1x!tpu.dma_semaphore, #tpu.memory_space<semaphore_mem>> -> memref<!tpu.dma_semaphore, #tpu.memory_space<semaphore_mem>>
    tpu.wait_dma2 semaphore(%7 : memref<!tpu.dma_semaphore, #tpu.memory_space<semaphore_mem>>) src(%arg1 : memref<2x8x32xf32, #tpu.memory_space<any>>) dst(%arg3 : memref<2x8x32xf32, #tpu.memory_space<any>>)
    return
  }
}

</mosaic_0001>

<bundles_post_ra>
// kernel: tpu_custom_call.1
= control target key start
LH: loop header
LB: loop body
LE: loop exit
PB: predicated region body
PF: predicated region fallthrough
CT: control target
= control target key end

     0   :  { %s65_s21 = smov [#allocation2]   ;;  %s66_s22 = smov [#allocation3]   ;;  %s102_s0 = inlined_call_operand.hbm [shape: f32[2,4,16,16], index: 0, kind: input, shape index: {}]   ;;  %s103_s2 = inlined_call_operand.hbm [shape: f32[2,4,16,16], index: 2, kind: output, shape index: {0}]   ;;  %s104_s1 = inlined_call_operand.hbm [shape: f32[2,8,32], index: 1, kind: input, shape index: {}]   ;;  %s105_s3 = inlined_call_operand.hbm [shape: f32[2,8,32], index: 3, kind: output, shape index: {1}]  }
   0x1   :  { %s13_s14 = sshll.u32 %s102_s0, 4  ;;  %s15_s17 = sshll.u32 %s103_s2, 4  ;;  %s14_s14 = int_to_ptr.hbm [resolvable:$true] %s13_s14  ;;  %s16_s17 = int_to_ptr.hbm [resolvable:$true] %s15_s17 }
   0x2   :  { %s25_s20 = sshll.u32 %s104_s1, 4  ;;  %s67_s23 = smov 0   ;;  %s26_s20 = int_to_ptr.hbm [resolvable:$true] %s25_s20 }
   0x3   :  { %19 = dma.general %s14_s14, 2048, %s16_s17, %s65_s21, %s66_s22, [#allocation4], %s67_s23, 0  }
   0x4   :  { %s27_s26 = sshll.u32 %s105_s3, 4  ;;  %s68_s0 = smov [#allocation2 + $0x1]   ;;  %s28_s26 = int_to_ptr.hbm [resolvable:$true] %s27_s26 }
   0x5   :  { %s69_s27 = smov [#allocation5]  }
   0x6   :  { %31 = dma.general %s26_s20, 256, %s28_s26, %s68_s0, %s69_s27, [#allocation6], %s67_s23, 0  }
   0x7   :  { %61 = dma.done.wait [#allocation2], 2048 }
   0x8   :  { %62 = vsyncadd [#allocation2], 4294965248 }
   0x9   :  { %63 = dma.done.wait [#allocation2 + $0x1], 256 }
   0xa   :  { %64 = vsyncadd [#allocation2 + $0x1], 4294967040 }
   0xb   :  { %41 = vsyncmov [#allocation2] }
   0xe   :  { %s42_s2 = vpop.sfrf %41 }
   0xf   :  { %p54_p0 = scmp.ne.s32.totalorder %s42_s2, 0 }
  0x11   :  { %46 = shalt.err (%p54_p0)  }
  0x12   :  { %48 = vsyncmov [#allocation2 + $0x1] }
  0x15   :  { %s49_s1 = vpop.sfrf %48 }
  0x16   :  { %p55_p1 = scmp.ne.s32.totalorder %s49_s1, 0 }
  0x18   :  { %53 = shalt.err (%p55_p1)  }

</bundles_post_ra>
